<compile_context>
chip_gen: v5e
topology: v5e:2x2
jax: 0.10.0
libtpu: 0.0.40
codegen_flags: <defaults>
</compile_context>

<pallas_src>
import functools

import numpy as np
import jax
import jax.numpy as jnp
from jax.experimental import pallas as pl
from jax.experimental.pallas import tpu as pltpu

PS = 25                  # pooling kernel size
PAD = PS // 2            # reflection pad = 12
EXPOSED_LEVEL = 0.5
EPS = 1.0 / 255.0


# ----------------------------------------------------------------------------
# Host-side constants: reflection-pad + 25-tap mean pooling as band matrices.
# ----------------------------------------------------------------------------
def _reflect(p, n):
    if p < 0:
        return -p
    if p >= n:
        return 2 * (n - 1) - p
    return p


@functools.lru_cache(maxsize=None)
def _band(n):
    # a[src, dst] = number of taps of the 25-wide window centered at `dst`
    # that land (after reflection) on input position `src`.
    a = np.zeros((n, n), dtype=np.float64)
    for dst in range(n):
        for k in range(PS):
            a[_reflect(dst - PAD + k, n), dst] += 1.0
    return a


@functools.lru_cache(maxsize=None)
def _pool_matrix(h, w, c, hwp):
    # K[h*W+w, i*W+j] = RowBand[h,i] * ColBand[w,j] / (PS*PS*C), zero-padded
    # to (hwp, hwp) so the lane axis is a multiple of 128.
    k = np.kron(_band(h), _band(w)) / float(PS * PS * c)
    out = np.zeros((hwp, hwp), dtype=np.float32)
    out[: h * w, : h * w] = k
    return out


@functools.lru_cache(maxsize=None)
def _row_band_t(h, hp):
    # RowBand^T (dst, src), zero-padded to (hp, hp).
    out = np.zeros((hp, hp), dtype=np.float32)
    out[:h, :h] = _band(h).T
    return out


@functools.lru_cache(maxsize=None)
def _col_band(w, wp, c):
    # ColBand (src, dst) carrying the full 1/(PS*PS*C) normalization,
    # zero-padded to (wp, wp).
    out = np.zeros((wp, wp), dtype=np.float32)
    out[:w, :w] = _band(w) / float(PS * PS * c)
    return out


# ----------------------------------------------------------------------------
# Small helpers
# ----------------------------------------------------------------------------
def _round_up(x, m):
    return (x + m - 1) // m * m


def _vmem_capacity_bytes():
    try:
        return int(pltpu.get_tpu_info().vmem_capacity_bytes)
    except Exception:
        return 64 << 20        # v7x-safe fallback


def _has_two_tensorcores():
    # Megacore chips (2 TC per jax device): v4 / v5p / v7x.
    try:
        kind = (jax.devices()[0].device_kind or "").lower()
        return any(t in kind for t in ("v4", "v5p", "v7"))
    except Exception:
        return False


def _pick_bt(b, per_image_bytes, target_bytes, two_tc, max_bt=256):
    bt = max(1, target_bytes // max(per_image_bytes, 1))
    if bt >= 8:
        bt = (bt // 8) * 8                      # 8-aligned sublane / MXU M dim
        bt = min(bt, max_bt, _round_up(b, 8))
    else:
        bt = min(bt, b)                         # huge frames: tiny tile
    if two_tc and bt >= b and bt > 8:
        # Only cap the tile (grid >= 2) when there are two TensorCores.
        bt = max(8, _round_up((b + 1) // 2, 8))
    return max(1, bt)


def _clip_vmem(requested, capacity):
    hi = max(16 << 20, min(capacity, 128 << 20))
    return int(min(max(requested, 16 << 20), hi))


# ----------------------------------------------------------------------------
# Kernels
# ----------------------------------------------------------------------------
def _iqa_kron_kernel(x_ref, k_ref, out_ref):
    # x_ref:   (Bt, C, HWp)   flattened images (lane axis = padded H*W)
    # k_ref:   (HWp, HWp)     reflect-pad + 25x25 mean + 1/C folded into one matrix
    # out_ref: (Bt, HWp)      dense 2-D output block
    bt = x_ref.shape[0]
    c = x_ref.shape[1]
    x = x_ref[...]

    # Channel statistics via an unrolled static loop over C (VPU elementwise).
    x0 = x[:, 0, :]
    mx = x0
    mn = x0
    s1 = x0
    s2 = x0 * x0
    for ci in range(1, c):
        xc = x[:, ci, :]
        mx = jnp.maximum(mx, xc)
        mn = jnp.minimum(mn, xc)
        s1 = s1 + xc
        s2 = s2 + xc * xc

    # Fused pooling: stack s1/s2 on the M axis -> ONE lane-dense MXU matmul.
    lhs = jnp.concatenate([s1, s2], axis=0)                       # (2*Bt, HWp)
    pooled = jnp.dot(lhs, k_ref[...], preferred_element_type=jnp.float32)
    mean_rgb = pooled[:bt]
    mean_sq = pooled[bt:]

    exposedness = jnp.abs(mean_rgb - EXPOSED_LEVEL) + EPS
    contrast = mean_sq - mean_rgb * mean_rgb
    sat_num = mx - mn + EPS

    # Both divides fused into a single approximate reciprocal (EUP slot).
    inv = pl.reciprocal((mx + EPS) * exposedness, approx=True)
    out_ref[...] = (sat_num * contrast * inv).astype(out_ref.dtype)


def _iqa_sep_kernel(x_ref, rbt_ref, cb_ref, out_ref):
    # x_ref:   (Bt, C, Hp, Wp)
    # rbt_ref: (Hp, Hp)   RowBand^T (padded)
    # cb_ref:  (Wp, Wp)   ColBand / (PS*PS*C) (padded)
    # out_ref: (Bt, Hp, Wp)
    bt, c, hp, wp = x_ref.shape
    x = x_ref[...]

    x0 = x[:, 0, :, :]
    mx = x0
    mn = x0
    s1 = x0
    s2 = x0 * x0
    for ci in range(1, c):
        xc = x[:, ci, :, :]
        mx = jnp.maximum(mx, xc)
        mn = jnp.minimum(mn, xc)
        s1 = s1 + xc
        s2 = s2 + xc * xc

    # Column pooling: fuse s1/s2 (stacked on batch) and fold (batch*rows) into
    # the MXU M dimension -> one lane-dense matmul.
    t = jnp.concatenate([s1, s2], axis=0)                         # (2Bt, Hp, Wp)
    a = jnp.dot(t.reshape(2 * bt * hp, wp), cb_ref[...],
                preferred_element_type=jnp.float32)
    a = a.reshape(2 * bt, hp, wp)

    # Row pooling: per-image 2-D matmuls (avoids an in-kernel lane<->sublane
    # transpose of a batched array; Bt is capped small on this path).
    rbt = rbt_ref[...]
    for b in range(bt):
        mean_rgb = jnp.dot(rbt, a[b], preferred_element_type=jnp.float32)
        mean_sq = jnp.dot(rbt, a[bt + b], preferred_element_type=jnp.float32)

        exposedness = jnp.abs(mean_rgb - EXPOSED_LEVEL) + EPS
        contrast = mean_sq - mean_rgb * mean_rgb
        sat_num = mx[b] - mn[b] + EPS
        inv = pl.reciprocal((mx[b] + EPS) * exposedness, approx=True)
        out_ref[b, :, :] = (sat_num * contrast * inv).astype(out_ref.dtype)


# ----------------------------------------------------------------------------
# Wrapper
# ----------------------------------------------------------------------------
def iqa(images, *, force_path=None, target_block_bytes=None):
    """images: (B, C, H, W) float32 -> (B, 1, H, W) float32."""
    B, C, H, W = images.shape
    assert H > PAD and W > PAD, "ReflectionPad2d requires pad < spatial dims"

    capacity = _vmem_capacity_bytes()
    if target_block_bytes is None:
        target_block_bytes = max(2 << 20, min(8 << 20, capacity // 8))

    dtype = images.dtype
    itemsize = jnp.dtype(dtype).itemsize
    c_phys = _round_up(C, 8)                     # physical sublane padding of C
    two_tc = _has_two_tensorcores()

    HW = H * W
    HWp = _round_up(HW, 128)
    kron_resident = 2 * HWp * HWp * 4            # K, double-buffered
    use_kron = (force_path == "kron") or (
        force_path is None and kron_resident <= capacity // 4)

    if use_kron:
        # -------- small frames: one folded (HWp, HWp) pooling matmul --------
        per_image = (c_phys * HWp + HWp) * itemsize
        bt = _pick_bt(B, per_image, target_block_bytes, two_tc)
        Bp = _round_up(B, bt)

        x_flat = images.reshape(B, C, HW)
        x_flat = jnp.pad(x_flat, ((0, Bp - B), (0, 0), (0, HWp - HW)))
        k_mat = jnp.asarray(_pool_matrix(H, W, C, HWp))

        in_block = bt * c_phys * HWp * itemsize
        out_block = bt * HWp * itemsize
        scratch = 10 * bt * HWp * 4
        vmem_limit = _clip_vmem(
            2 * in_block + 2 * out_block + kron_resident + scratch + (2 << 20),
            capacity)

        out = pl.pallas_call(
            _iqa_kron_kernel,
            out_shape=jax.ShapeDtypeStruct((Bp, HWp), dtype),
            grid_spec=pltpu.PrefetchScalarGridSpec(
                num_scalar_prefetch=0,
                grid=(Bp // bt,),
                in_specs=[
                    pl.BlockSpec((bt, C, HWp), lambda b: (b, 0, 0)),
                    pl.BlockSpec((HWp, HWp), lambda b: (0, 0)),
                ],
                out_specs=pl.BlockSpec((bt, HWp), lambda b: (b, 0)),
            ),
            compiler_params=pltpu.CompilerParams(
                dimension_semantics=("parallel",),
                vmem_limit_bytes=vmem_limit,
            ),
        )(x_flat, k_mat)
        return out[:B, :HW].reshape(B, 1, H, W)

    # -------- scalable path: separable row/column band matmuls --------
    Hp = _round_up(H, 8)
    Wp = _round_up(W, 128)
    per_image = (c_phys * Hp * Wp + Hp * Wp) * itemsize
    bt = _pick_bt(B, per_image, target_block_bytes, two_tc, max_bt=8)
    Bp = _round_up(B, bt)

    x_pad = jnp.pad(images, ((0, Bp - B), (0, 0), (0, Hp - H), (0, Wp - W)))
    rbt = jnp.asarray(_row_band_t(H, Hp))
    cb = jnp.asarray(_col_band(W, Wp, C))

    in_block = bt * c_phys * Hp * Wp * itemsize
    out_block = bt * Hp * Wp * itemsize
    bands = 2 * (Hp * Hp + Wp * Wp) * 4
    scratch = 12 * bt * Hp * Wp * 4
    vmem_limit = _clip_vmem(
        2 * in_block + 2 * out_block + bands + scratch + (2 << 20), capacity)

    out = pl.pallas_call(
        _iqa_sep_kernel,
        out_shape=jax.ShapeDtypeStruct((Bp, Hp, Wp), dtype),
        grid_spec=pltpu.PrefetchScalarGridSpec(
            num_scalar_prefetch=0,
            grid=(Bp // bt,),
            in_specs=[
                pl.BlockSpec((bt, C, Hp, Wp), lambda b: (b, 0, 0, 0)),
                pl.BlockSpec((Hp, Hp), lambda b: (0, 0)),
                pl.BlockSpec((Wp, Wp), lambda b: (0, 0)),
            ],
            out_specs=pl.BlockSpec((bt, Hp, Wp), lambda b: (b, 0, 0)),
        ),
        compiler_params=pltpu.CompilerParams(
            dimension_semantics=("parallel",),
            vmem_limit_bytes=vmem_limit,
        ),
    )(x_pad, rbt, cb)
    return out[:B, :H, :W][:, None, :, :]


# ----------------------------------------------------------------------------
# Plain-JAX reference (mirrors the PyTorch module exactly, exact division).
# ----------------------------------------------------------------------------
def _iqa_ref(images):
    B, C, H, W = images.shape
    padded = jnp.pad(images, ((0, 0), (0, 0), (PAD, PAD), (PAD, PAD)),
                     mode="reflect")
    max_rgb = jnp.max(images, axis=1, keepdims=True)
    min_rgb = jnp.min(images, axis=1, keepdims=True)
    saturation = (max_rgb - min_rgb + EPS) / (max_rgb + EPS)

    def pool(a):  # (B, C, Hp, Wp) -> (B, 1, H, W)
        m = jnp.mean(a, axis=1, keepdims=True)
        rs = sum(m[:, :, k:k + H, :] for k in range(PS))
        cs = sum(rs[:, :, :, k:k + W] for k in range(PS))
        return cs / (PS * PS)

    mean_rgb = pool(padded)
    mean_sq = pool(padded * padded)
    exposedness = jnp.abs(mean_rgb - EXPOSED_LEVEL) + EPS
    contrast = mean_sq - mean_rgb ** 2
    return saturation * contrast / exposedness


if __name__ == "__main__":
    key = jax.random.PRNGKey(0)
    k1, k2 = jax.random.split(key)

    # Small-frame test: exercises the lane-dense kron path (HW = 256).
    B, C, H, W = 2, 3, 16, 16
    images = jax.random.uniform(k1, (B, C, H, W), dtype=jnp.float32)
    out = jax.block_until_ready(iqa(images))
    ref = _iqa_ref(images)
    assert out.shape == (B, 1, H, W)
    # Tolerance covers the EUP approximate reciprocal (~1e-3 relative error).
    assert jnp.allclose(out, ref, rtol=1e-2, atol=1e-4), "kron path mismatch"

    # Second small test forcing the scalable separable band-matmul path.
    B2, C2, H2, W2 = 2, 3, 24, 24
    images2 = jax.random.uniform(k2, (B2, C2, H2, W2), dtype=jnp.float32)
    out2 = jax.block_until_ready(iqa(images2, force_path="separable"))
    ref2 = _iqa_ref(images2)
    assert out2.shape == (B2, 1, H2, W2)
    assert jnp.allclose(out2, ref2, rtol=1e-2, atol=1e-4), "separable path mismatch"

    print("KERNEL_OK")
</pallas_src>

<mosaic_0001>
module attributes {stable_mosaic.version = 11 : i64} {
  func.func @_iqa_kron_kernel(%arg0: i32, %arg1: memref<8x3x256xf32, #tpu.memory_space<vmem>>, %arg2: memref<256x256xf32, #tpu.memory_space<vmem>>, %arg3: memref<8x256xf32, #tpu.memory_space<vmem>>) attributes {dimension_semantics = [#tpu.dimension_semantics<parallel>], iteration_bounds = array<i64: 1>, scalar_prefetch = 0 : i64, scratch_operands = 0 : i64, tpu.core_type = #tpu.core_type<tc>, window_params = [{transform_indices = @transform_0, window_bounds = array<i64: 8, 3, 256>}, {pipeline_mode = #tpu.pipeline_mode<synchronous>, transform_indices = @transform_1, window_bounds = array<i64: 256, 256>}, {transform_indices = @transform_2, window_bounds = array<i64: 8, 256>}]} {
    %c0 = arith.constant 0 : index
    %c0_0 = arith.constant 0 : index
    %c0_1 = arith.constant 0 : index
    %0 = vector.load %arg1[%c0, %c0_0, %c0_1] : memref<8x3x256xf32, #tpu.memory_space<vmem>>, vector<8x3x256xf32>
    %1 = vector.extract_strided_slice %0 {offsets = [0, 0, 0], sizes = [8, 1, 256], strides = [1, 1, 1]} : vector<8x3x256xf32> to vector<8x1x256xf32>
    %2 = vector.shape_cast %1 : vector<8x1x256xf32> to vector<8x256xf32>
    %3 = arith.mulf %2, %2 : vector<8x256xf32>
    %4 = vector.extract_strided_slice %0 {offsets = [0, 1, 0], sizes = [8, 1, 256], strides = [1, 1, 1]} : vector<8x3x256xf32> to vector<8x1x256xf32>
    %5 = vector.shape_cast %4 : vector<8x1x256xf32> to vector<8x256xf32>
    %6 = arith.maximumf %2, %5 : vector<8x256xf32>
    %7 = arith.minimumf %2, %5 : vector<8x256xf32>
    %8 = arith.addf %2, %5 : vector<8x256xf32>
    %9 = arith.mulf %5, %5 : vector<8x256xf32>
    %10 = arith.addf %3, %9 : vector<8x256xf32>
    %11 = vector.extract_strided_slice %0 {offsets = [0, 2, 0], sizes = [8, 1, 256], strides = [1, 1, 1]} : vector<8x3x256xf32> to vector<8x1x256xf32>
    %12 = vector.shape_cast %11 : vector<8x1x256xf32> to vector<8x256xf32>
    %13 = arith.maximumf %6, %12 : vector<8x256xf32>
    %14 = arith.minimumf %7, %12 : vector<8x256xf32>
    %15 = arith.addf %8, %12 : vector<8x256xf32>
    %16 = arith.mulf %12, %12 : vector<8x256xf32>
    %17 = arith.addf %10, %16 : vector<8x256xf32>
    %18 = tpu.concatenate %15, %17 in 0 : vector<8x256xf32>, vector<8x256xf32> -> vector<16x256xf32>
    %c0_2 = arith.constant 0 : index
    %c0_3 = arith.constant 0 : index
    %19 = vector.load %arg2[%c0_2, %c0_3] : memref<256x256xf32, #tpu.memory_space<vmem>>, vector<256x256xf32>
    %cst = arith.constant dense<0.000000e+00> : vector<16x256xf32>
    %20 = tpu.matmul %18, %19, %cst {dimension_numbers = #tpu.dot_dimension_numbers<[1], [0], [0], [1], [0, 0, 1, 1], [], []>} : vector<16x256xf32>, vector<256x256xf32>, vector<16x256xf32> -> vector<16x256xf32>
    %21 = vector.extract_strided_slice %20 {offsets = [0, 0], sizes = [8, 256], strides = [1, 1]} : vector<16x256xf32> to vector<8x256xf32>
    %22 = vector.extract_strided_slice %20 {offsets = [8, 0], sizes = [8, 256], strides = [1, 1]} : vector<16x256xf32> to vector<8x256xf32>
    %cst_4 = arith.constant 5.000000e-01 : f32
    %23 = vector.broadcast %cst_4 : f32 to vector<8x256xf32>
    %24 = arith.subf %21, %23 : vector<8x256xf32>
    %25 = math.absf %24 : vector<8x256xf32>
    %cst_5 = arith.constant 0.00392156886 : f32
    %26 = vector.broadcast %cst_5 : f32 to vector<8x256xf32>
    %27 = arith.addf %25, %26 : vector<8x256xf32>
    %28 = arith.mulf %21, %21 : vector<8x256xf32>
    %29 = arith.subf %22, %28 : vector<8x256xf32>
    %30 = arith.subf %13, %14 : vector<8x256xf32>
    %cst_6 = arith.constant 0.00392156886 : f32
    %31 = vector.broadcast %cst_6 : f32 to vector<8x256xf32>
    %32 = arith.addf %30, %31 : vector<8x256xf32>
    %cst_7 = arith.constant 0.00392156886 : f32
    %33 = vector.broadcast %cst_7 : f32 to vector<8x256xf32>
    %34 = arith.addf %13, %33 : vector<8x256xf32>
    %35 = arith.mulf %34, %27 : vector<8x256xf32>
    %36 = tpu.reciprocal %35 {approx = true} : vector<8x256xf32> -> vector<8x256xf32>
    %37 = arith.mulf %32, %29 : vector<8x256xf32>
    %38 = arith.mulf %37, %36 : vector<8x256xf32>
    %c0_8 = arith.constant 0 : index
    %c0_9 = arith.constant 0 : index
    %39 = vector.load %arg3[%c0_8, %c0_9] : memref<8x256xf32, #tpu.memory_space<vmem>>, vector<8x256xf32>
    tpu.vector_store %arg3[%c0_8, %c0_9], %38 {strides = array<i32>} : memref<8x256xf32, #tpu.memory_space<vmem>>, vector<8x256xf32>,
    return
  }
  func.func @transform_0(%arg0: i32) -> (i32, i32, i32) {
    %c0_i32 = arith.constant 0 : i32
    %c0_i32_0 = arith.constant 0 : i32
    %c0_i32_1 = arith.constant 0 : i32
    return %arg0, %c0_i32, %c0_i32_0 : i32, i32, i32
  }
  func.func @transform_1(%arg0: i32) -> (i32, i32) {
    %c0_i32 = arith.constant 0 : i32
    %c0_i32_0 = arith.constant 0 : i32
    %c0_i32_1 = arith.constant 0 : i32
    return %c0_i32, %c0_i32_0 : i32, i32
  }
  func.func @transform_2(%arg0: i32) -> (i32, i32) {
    %c0_i32 = arith.constant 0 : i32
    %c0_i32_0 = arith.constant 0 : i32
    return %arg0, %c0_i32 : i32, i32
  }
}

</mosaic_0001>

<bundles_post_ra>
// kernel: tpu_custom_call.1
= control target key start
LH: loop header
LB: loop body
LE: loop exit
PB: predicated region body
PF: predicated region fallthrough
CT: control target
= control target key end

     0   :  { %7 = vsyncpa [#allocation3], 0  ;;  %s1011_s0 = inlined_call_operand.vmem [shape: f32[8,3,256], index: 0, kind: input, shape index: {}]   ;;  %s1012_s1 = inlined_call_operand.hbm [shape: f32[256,256], index: 1, kind: input, shape index: {}]   ;;  %s1013_s2 = inlined_call_operand.hbm [shape: f32[8,256], index: 2, kind: output, shape index: {}]  }
   0x1   :  { %8 = vsyncpa [#allocation4], 0  ;;  %s15_s11 = sshll.u32 %s1012_s1, 4  ;;  %s719_s12 = smov [#allocation2]   ;;  %s16_s11 = int_to_ptr.hbm [resolvable:$true] %s15_s11 }
   0x2   :  { %s17_s13 = sshll.u32 %s719_s12, 4  ;;  %s720_s14 = smov 256   ;;  %s18_s13 = int_to_ptr.vmem [resolvable:$true] %s17_s13 }
   0x3   :  { %s721_s15 = smov 16  }
   0x4   :  { %23 = dma.hbm_to_vmem [thread:$0]  %s16_s11, 8192, %s18_s13, [#allocation3], %s720_s14, %s720_s14, %s721_s15  }
   0x5   :  { %715 = dma.done.wait [#allocation3], 8192  }
   0x6   :  { %716 = vsyncadd [#allocation3], 4294959104  ;;  %v338_v0 = vld [vmem:[#allocation2 + $0xf8] sm:$0xff]  ;;  %v337_v2 = vld [vmem:[#allocation2 + $0xf0] sm:$0xff]  ;;  %vm244_vm0 = vcmask 1041409   ;;  %vm246_vm1 = vcmask 1042434  }
   0x7   :  { %v370_v1 = vld [vmem:[#allocation2 + $0x1f8] sm:$0xff]  ;;  %417 = vmatpush.msra.mxu2 %v338_v0  ;;  %v369_v3 = vld [vmem:[#allocation2 + $0x1f0] sm:$0xff]  ;;  %v336_v4 = vld [vmem:[#allocation2 + $0xe8] sm:$0xff]  ;;  %371 = vmatpush.msra.mxu0 %v337_v2  ;;  %vm248_vm2 = vcmask 1043459   ;;  %vm250_vm3 = vcmask 1044484   ;;  %vm252_vm4 = vcmask 1045509  }
   0x8   :  { %440 = vmatpush.msra.mxu3 %v370_v1  ;;  %v368_v5 = vld [vmem:[#allocation2 + $0x1e8] sm:$0xff]  ;;  %394 = vmatpush.msra.mxu1 %v369_v3  ;;  %v335_v6 = vld [vmem:[#allocation2 + $0xe0] sm:$0xff]  ;;  %v334_v8 = vld [vmem:[#allocation2 + $0xd8] sm:$0xff]  ;;  %vm254_vm5 = vcmask 1046534   ;;  %vm256_vm6 = vcmask 1047559   ;;  %vm500_vm7 = vcmask 1043456  }
   0x9   :  { %v367_v7 = vld [vmem:[#allocation2 + $0x1e0] sm:$0xff]  ;;  %418 = vmatpush.msra.mxu2 %v336_v4  ;;  %v366_v9 = vld [vmem:[#allocation2 + $0x1d8] sm:$0xff]  ;;  %v333_v10 = vld [vmem:[#allocation2 + $0xd0] sm:$0xff]  ;;  %372 = vmatpush.msra.mxu0 %v335_v6  ;;  %s619_s6 = sshll.u32 %s1013_s2, 4  ;;  %s620_s6 = int_to_ptr.hbm [resolvable:$true] %s619_s6 }
   0xa   :  { %441 = vmatpush.msra.mxu3 %v368_v5  ;;  %v365_v11 = vld [vmem:[#allocation2 + $0x1d0] sm:$0xff]  ;;  %395 = vmatpush.msra.mxu1 %v367_v7  ;;  %v332_v12 = vld [vmem:[#allocation2 + $0xc8] sm:$0xff]  ;;  %v331_v14 = vld [vmem:[#allocation2 + $0xc0] sm:$0xff] }
   0xb   :  { %v364_v13 = vld [vmem:[#allocation2 + $0x1c8] sm:$0xff]  ;;  %419 = vmatpush.msra.mxu2 %v334_v8  ;;  %v363_v15 = vld [vmem:[#allocation2 + $0x1c0] sm:$0xff]  ;;  %373 = vmatpush.msra.mxu0 %v333_v10  ;;  %v330_v16 = vld [vmem:[#allocation2 + $0xb8] sm:$0xff] }
   0xc   :  { %442 = vmatpush.msra.mxu3 %v366_v9  ;;  %396 = vmatpush.msra.mxu1 %v365_v11  ;;  %v362_v17 = vld [vmem:[#allocation2 + $0x1b8] sm:$0xff]  ;;  %v329_v18 = vld [vmem:[#allocation2 + $0xb0] sm:$0xff]  ;;  %v328_v20 = vld [vmem:[#allocation2 + $0xa8] sm:$0xff] }
   0xd   :  { %420 = vmatpush.msra.mxu2 %v332_v12  ;;  %v361_v19 = vld [vmem:[#allocation2 + $0x1b0] sm:$0xff]  ;;  %374 = vmatpush.msra.mxu0 %v331_v14  ;;  %v360_v21 = vld [vmem:[#allocation2 + $0x1a8] sm:$0xff]  ;;  %v327_v22 = vld [vmem:[#allocation2 + $0xa0] sm:$0xff] }
   0xe   :  { %443 = vmatpush.msra.mxu3 %v364_v13  ;;  %397 = vmatpush.msra.mxu1 %v363_v15  ;;  %v359_v23 = vld [vmem:[#allocation2 + $0x1a0] sm:$0xff]  ;;  %v326_v24 = vld [vmem:[#allocation2 + $0x98] sm:$0xff]  ;;  %v325_v26 = vld [vmem:[#allocation2 + $0x90] sm:$0xff] }
   0xf   :  { %421 = vmatpush.msra.mxu2 %v330_v16  ;;  %375 = vmatpush.msra.mxu0 %v329_v18  ;;  %v358_v25 = vld [vmem:[#allocation2 + $0x198] sm:$0xff]  ;;  %v357_v27 = vld [vmem:[#allocation2 + $0x190] sm:$0xff]  ;;  %v324_v28 = vld [vmem:[#allocation2 + $0x88] sm:$0xff] }
  0x10   :  { %444 = vmatpush.msra.mxu3 %v362_v17  ;;  %398 = vmatpush.msra.mxu1 %v361_v19  ;;  %v356_v29 = vld [vmem:[#allocation2 + $0x188] sm:$0xff]  ;;  %v323_v30 = vld [vmem:[#allocation2 + $0x80] sm:$0xff]  ;;  %v322_v32 = vld [vmem:[#allocation2 + $0x78] sm:$0xff] }
  0x11   :  { %422 = vmatpush.msra.mxu2 %v328_v20  ;;  %376 = vmatpush.msra.mxu0 %v327_v22  ;;  %v355_v31 = vld [vmem:[#allocation2 + $0x180] sm:$0xff]  ;;  %v354_v33 = vld [vmem:[#allocation2 + $0x178] sm:$0xff]  ;;  %v321_v34 = vld [vmem:[#allocation2 + $0x70] sm:$0xff] }
  0x12   :  { %445 = vmatpush.msra.mxu3 %v360_v21  ;;  %399 = vmatpush.msra.mxu1 %v359_v23  ;;  %v353_v35 = vld [vmem:[#allocation2 + $0x170] sm:$0xff]  ;;  %v320_v36 = vld [vmem:[#allocation2 + $0x68] sm:$0xff]  ;;  %v319_v38 = vld [vmem:[#allocation2 + $0x60] sm:$0xff] }
  0x13   :  { %423 = vmatpush.msra.mxu2 %v326_v24  ;;  %377 = vmatpush.msra.mxu0 %v325_v26  ;;  %v352_v37 = vld [vmem:[#allocation2 + $0x168] sm:$0xff]  ;;  %v351_v39 = vld [vmem:[#allocation2 + $0x160] sm:$0xff]  ;;  %v318_v40 = vld [vmem:[#allocation2 + $0x58] sm:$0xff] }
  0x14   :  { %446 = vmatpush.msra.mxu3 %v358_v25  ;;  %400 = vmatpush.msra.mxu1 %v357_v27  ;;  %v350_v41 = vld [vmem:[#allocation2 + $0x158] sm:$0xff]  ;;  %v317_v42 = vld [vmem:[#allocation2 + $0x50] sm:$0xff]  ;;  %v316_v44 = vld [vmem:[#allocation2 + $0x48] sm:$0xff] }
  0x15   :  { %424 = vmatpush.msra.mxu2 %v324_v28  ;;  %378 = vmatpush.msra.mxu0 %v323_v30  ;;  %v349_v43 = vld [vmem:[#allocation2 + $0x150] sm:$0xff]  ;;  %v348_v45 = vld [vmem:[#allocation2 + $0x148] sm:$0xff]  ;;  %v315_v46 = vld [vmem:[#allocation2 + $0x40] sm:$0xff] }
  0x16   :  { %447 = vmatpush.msra.mxu3 %v356_v29  ;;  %401 = vmatpush.msra.mxu1 %v355_v31  ;;  %v347_v47 = vld [vmem:[#allocation2 + $0x140] sm:$0xff]  ;;  %v314_v48 = vld [vmem:[#allocation2 + $0x38] sm:$0xff]  ;;  %v313_v51 = vld [vmem:[#allocation2 + $0x30] sm:$0xff] }
  0x17   :  { %425 = vmatpush.msra.mxu2 %v322_v32  ;;  %379 = vmatpush.msra.mxu0 %v321_v34  ;;  %v346_v49 = vld [vmem:[#allocation2 + $0x138] sm:$0xff]  ;;  %v744_v50 = vld [vmem:[%s1011_s0] sm:$0x77]  ;;  %v345_v52 = vld [vmem:[#allocation2 + $0x130] sm:$0xff] }
  0x18   :  { %448 = vmatpush.msra.mxu3 %v354_v33  ;;  %402 = vmatpush.msra.mxu1 %v353_v35  ;;  %v749_v53 = vld [vmem:[%s1011_s0 + $0x8] sm:$0x77]  ;;  %v754_v54 = vld [vmem:[%s1011_s0 + $0x10] sm:$0x77]  ;;  %v759_v55 = vld [vmem:[%s1011_s0 + $0x18] sm:$0x77]  ;;  %v778_v59 = vmul.f32 %v744_v50, %v744_v50 }
  0x19   :  { %426 = vmatpush.msra.mxu2 %v320_v36  ;;  %380 = vmatpush.msra.mxu0 %v319_v38  ;;  %v764_v56 = vld [vmem:[%s1011_s0 + $0x20] sm:$0x77]  ;;  %v769_v57 = vld [vmem:[%s1011_s0 + $0x28] sm:$0x77]  ;;  %v774_v58 = vld [vmem:[%s1011_s0 + $0x30] sm:$0x77]  ;;  %v782_v60 = vmul.f32 %v749_v53, %v749_v53 }
  0x1a   :  { %449 = vmatpush.msra.mxu3 %v352_v37  ;;  %403 = vmatpush.msra.mxu1 %v351_v39  ;;  %v787_v61 = vld [vmem:[%s1011_s0 + $0x38] sm:$0x77]  ;;  %v52_v62 = vrot.slane %v744_v50, 5  ;;  %v54_v63 = vrot.slane %v749_v53, 5  ;;  %v56_v0 = vrot.slane %v754_v54, 5  ;;  %v58_v1 = vrot.slane %v759_v55, 5 }
  0x1b   :  { %427 = vmatpush.msra.mxu2 %v318_v40  ;;  %381 = vmatpush.msra.mxu0 %v317_v42  ;;  %v312_v2 = vld [vmem:[#allocation2 + $0x28] sm:$0xff]  ;;  %v60_v4 = vrot.slane %v764_v56, 5  ;;  %v62_v5 = vrot.slane %v769_v57, 5  ;;  %v64_v6 = vrot.slane %v774_v58, 5  ;;  %v66_v7 = vrot.slane %v787_v61, 5  ;;  %v311_v8 = vld [vmem:[#allocation2 + $0x20] sm:$0xff] }
  0x1c   :  { %450 = vmatpush.msra.mxu3 %v350_v41  ;;  %404 = vmatpush.msra.mxu1 %v349_v43  ;;  %v344_v3 = vld [vmem:[#allocation2 + $0x128] sm:$0xff]  ;;  %v343_v9 = vld [vmem:[#allocation2 + $0x120] sm:$0xff]  ;;  %v797_v10 = vrot.slane %v52_v62, 4  ;;  %v799_v11 = vrot.slane %v54_v63, 4  ;;  %v801_v12 = vrot.slane %v56_v0, 4  ;;  %v803_v13 = vrot.slane %v58_v1, 4 }
  0x1d   :  { %428 = vmatpush.msra.mxu2 %v316_v44  ;;  %382 = vmatpush.msra.mxu0 %v315_v46  ;;  %v310_v14 = vld [vmem:[#allocation2 + $0x18] sm:$0xff]  ;;  %v805_v16 = vrot.slane %v60_v4, 4  ;;  %v807_v17 = vrot.slane %v62_v5, 4  ;;  %v809_v18 = vrot.slane %v64_v6, 4  ;;  %v811_v19 = vrot.slane %v66_v7, 4  ;;  %v309_v20 = vld [vmem:[#allocation2 + $0x10] sm:$0xff] }
  0x1e   :  { %451 = vmatpush.msra.mxu3 %v348_v45  ;;  %405 = vmatpush.msra.mxu1 %v347_v47  ;;  %v342_v15 = vld [vmem:[#allocation2 + $0x118] sm:$0xff]  ;;  %v341_v21 = vld [vmem:[#allocation2 + $0x110] sm:$0xff]  ;;  %v92_v22 = vadd.f32 %v797_v10, %v744_v50  ;;  %v93_v23 = vadd.f32 %v799_v11, %v749_v53  ;;  %v94_v24 = vadd.f32 %v801_v12, %v754_v54  ;;  %v140_v25 = vrot.slane %v744_v50, 6  ;;  %v308_v26 = vld [vmem:[#allocation2 + $0x8] sm:$0xff]  ;;  %s722_s0 = smov [#allocation5]  }
  0x1f   :  { %429 = vmatpush.msra.mxu2 %v314_v48  ;;  %383 = vmatpush.msra.mxu0 %v313_v51  ;;  %v340_v27 = vld [vmem:[#allocation2 + $0x108] sm:$0xff]  ;;  %v81_v28 = vmax.f32 %v769_v57, %v807_v17  ;;  %v82_v29 = vmax.f32 %v774_v58, %v809_v18  ;;  %v83_v30 = vmax.f32 %v787_v61, %v811_v19  ;;  %v142_v31 = vrot.slane %v749_v53, 6  ;;  %v307_v36 = vld [vmem:[#allocation2] sm:$0xff]  ;;  %s617_s3 = sshll.u32 %s722_s0, 4  ;;  %s618_s3 = int_to_ptr.vmem [resolvable:$true] %s617_s3 }
  0x20   :  { %452 = vmatpush.msra.mxu3 %v346_v49  ;;  %406 = vmatpush.msra.mxu1 %v345_v52  ;;  %v89_v32 = vmin.f32 %v769_v57, %v807_v17  ;;  %v90_v33 = vmin.f32 %v774_v58, %v809_v18  ;;  %v91_v34 = vmin.f32 %v787_v61, %v811_v19  ;;  %v833_v35 = vrot.slane %v140_v25, 4  ;;  %v339_v37 = vld [vmem:[#allocation2 + $0x100] sm:$0xff] }
  0x21   :  { %430 = vmatpush.msra.mxu2 %v312_v2  ;;  %384 = vmatpush.msra.mxu0 %v311_v8  ;;  %v95_v38 = vadd.f32 %v803_v13, %v759_v55  ;;  %v96_v39 = vadd.f32 %v805_v16, %v764_v56  ;;  %v97_v40 = vadd.f32 %v807_v17, %v769_v57  ;;  %v841_v41 = vrot.slane %v142_v31, 4 }
  0x22   :  { %453 = vmatpush.msra.mxu3 %v344_v3  ;;  %407 = vmatpush.msra.mxu1 %v343_v9  ;;  %v98_v42 = vadd.f32 %v809_v18, %v774_v58  ;;  %v99_v43 = vadd.f32 %v811_v19, %v787_v61  ;;  %v144_v44 = vrot.slane %v754_v54, 6  ;;  %v146_v45 = vrot.slane %v759_v55, 6 }
  0x23   :  { %431 = vmatpush.msra.mxu2 %v310_v14  ;;  %385 = vmatpush.msra.mxu0 %v309_v20  ;;  %v148_v46 = vrot.slane %v764_v56, 6  ;;  %v150_v47 = vrot.slane %v769_v57, 6  ;;  %v152_v48 = vrot.slane %v774_v58, 6  ;;  %v154_v49 = vrot.slane %v787_v61, 6 }
  0x24   :  { %454 = vmatpush.msra.mxu3 %v342_v15  ;;  %408 = vmatpush.msra.mxu1 %v341_v21  ;;  %v853_v51 = vrot.slane %v144_v44, 4  ;;  %v855_v52 = vrot.slane %v146_v45, 4  ;;  %v180_v62 = vadd.f32 %v833_v35, %v92_v22  ;;  %v181_v63 = vadd.f32 %v841_v41, %v93_v23 }
  0x25   :  { %432 = vmatpush.msra.mxu2 %v308_v26  ;;  %386 = vmatpush.msra.mxu0 %v307_v36  ;;  %v859_v0 = vrot.slane %v148_v46, 4  ;;  %v151_v1 = vrot.slane %v150_v47, 4  ;;  %v153_v2 = vrot.slane %v152_v48, 4  ;;  %v155_v3 = vrot.slane %v154_v49, 4 }
  0x26   :  { %455 = vmatpush.msra.mxu3 %v340_v27  ;;  %409 = vmatpush.msra.mxu1 %v339_v37  ;;  %v182_v4 = vadd.f32 %v853_v51, %v94_v24  ;;  %v183_v5 = vadd.f32 %v855_v52, %v95_v38  ;;  %v228_v6 = vperm.slane %v180_v62, 0  ;;  %v230_v7 = vperm.slane %v181_v63, 0 }
  0x27   :  { %v863_v8 = vmax.f32 %v81_v28, %v151_v1  ;;  %v865_v9 = vmax.f32 %v82_v29, %v153_v2  ;;  %v867_v14 = vmax.f32 %v83_v30, %v155_v3  ;;  %v869_v15 = vmin.f32 %v89_v32, %v151_v1 }
  0x28   :  { %v871_v17 = vmin.f32 %v90_v33, %v153_v2  ;;  %v873_v18 = vmin.f32 %v91_v34, %v155_v3  ;;  %v184_v19 = vadd.f32 %v859_v0, %v96_v39  ;;  %v185_v20 = vadd.f32 %v151_v1, %v97_v40 }
  0x29   :  { %v186_v21 = vadd.f32 %v153_v2, %v98_v42  ;;  %v187_v22 = vadd.f32 %v155_v3, %v99_v43  ;;  %v232_v23 = vperm.slane %v182_v4, 0  ;;  %v234_v24 = vperm.slane %v183_v5, 0 }
  0x2a   :  { %v236_v25 = vperm.slane %v184_v19, 0  ;;  %v238_v26 = vperm.slane %v185_v20, 0  ;;  %v245_v27 = vsel %vm244_vm0, %v230_v7, %v228_v6  ;;  %v38_v28 = vmul.f32 %v754_v54, %v754_v54 }
  0x2b   :  { %v240_v29 = vperm.slane %v186_v21, 0  ;;  %v242_v30 = vperm.slane %v187_v22, 0  ;;  %v247_v31 = vsel %vm246_vm1, %v232_v23, %v245_v27  ;;  %v39_v32 = vmul.f32 %v759_v55, %v759_v55 }
  0x2c   :  { %v249_v33 = vsel %vm248_vm2, %v234_v24, %v247_v31  ;;  %v229_v34 = vperm.slane %v180_v62, 4  ;;  %v231_v36 = vperm.slane %v181_v63, 4  ;;  %v233_v37 = vperm.slane %v182_v4, 4 }
  0x2d   :  { %v251_v38 = vsel %vm250_vm3, %v236_v25, %v249_v33  ;;  %v235_v39 = vperm.slane %v183_v5, 4  ;;  %v237_v40 = vperm.slane %v184_v19, 4  ;;  %v239_v42 = vperm.slane %v185_v20, 4 }
  0x2e   :  { %v253_v43 = vsel %vm252_vm4, %v238_v26, %v251_v38  ;;  %v241_v44 = vperm.slane %v186_v21, 4  ;;  %v243_v45 = vperm.slane %v187_v22, 4  ;;  %v258_v46 = vsel %vm244_vm0, %v231_v36, %v229_v34 }
  0x2f   :  { %v255_v47 = vsel %vm254_vm5, %v240_v29, %v253_v43  ;;  %v259_v48 = vsel %vm246_vm1, %v233_v37, %v258_v46  ;;  %v40_v49 = vmul.f32 %v764_v56, %v764_v56  ;;  %v41_v62 = vmul.f32 %v769_v57, %v769_v57 }
  0x30   :  { %v257_v63 = vsel %vm256_vm6, %v242_v30, %v255_v47  ;;  %v260_v1 = vsel %vm248_vm2, %v235_v39, %v259_v48  ;;  %v42_v2 = vmul.f32 %v774_v58, %v774_v58  ;;  %v43_v3 = vmul.f32 %v787_v61, %v787_v61 }
  0x31   :  { %433 = vmatmul.f32.vlgmr.msra.gmra.mxu2 %v257_v63  ;;  %v261_v4 = vsel %vm250_vm3, %v237_v40, %v260_v1  ;;  %387 = vmatmul.f32.vlgmr.msra.gmra.mxu0 %v257_v63  ;;  %v629_v5 = vrot.slane %v778_v59, 9  ;;  %v630_v6 = vrot.slane %v782_v60, 9  ;;  %v631_v7 = vrot.slane %v38_v28, 9 }
  0x32   :  { %v262_v57 = vsel %vm252_vm4, %v239_v42, %v261_v4  ;;  %v632_v19 = vrot.slane %v39_v32, 9  ;;  %v633_v20 = vrot.slane %v40_v49, 9  ;;  %v634_v21 = vrot.slane %v41_v62, 9 }
  0x33   :  { %v263_v22 = vsel %vm254_vm5, %v241_v44, %v262_v57  ;;  %v635_v58 = vrot.slane %v42_v2, 9  ;;  %v636_v23 = vrot.slane %v43_v3, 9  ;;  %v132_v61 = vadd.f32 %v629_v5, %v778_v59 }
  0x34   :  { %v264_v24 = vsel %vm256_vm6, %v243_v45, %v263_v22  ;;  %v133_v25 = vadd.f32 %v630_v6, %v782_v60  ;;  %v134_v26 = vadd.f32 %v631_v7, %v38_v28  ;;  %v135_v27 = vadd.f32 %v632_v19, %v39_v32 }
  0x35   :  { %456 = vmatmul.f32.vlgmr.msra.gmra.mxu3 %v264_v24  ;;  %410 = vmatmul.f32.vlgmr.msra.gmra.mxu1 %v264_v24  ;;  %v136_v29 = vadd.f32 %v633_v20, %v40_v49  ;;  %v137_v30 = vadd.f32 %v634_v21, %v41_v62  ;;  %v138_v31 = vadd.f32 %v635_v58, %v42_v2  ;;  %v637_v33 = vrot.slane %v778_v59, 10 }
  0x36   :  { %v139_v34 = vadd.f32 %v636_v23, %v43_v3  ;;  %v638_v36 = vrot.slane %v782_v60, 10  ;;  %v639_v37 = vrot.slane %v38_v28, 10  ;;  %v640_v38 = vrot.slane %v39_v32, 10 }
  0x37   :  { %v641_v39 = vrot.slane %v40_v49, 10  ;;  %v642_v40 = vrot.slane %v41_v62, 10  ;;  %v643_v42 = vrot.slane %v42_v2, 10  ;;  %v644_v43 = vrot.slane %v43_v3, 10 }
  0x38   :  { %v212_v44 = vadd.f32 %v637_v33, %v132_v61  ;;  %v213_v45 = vadd.f32 %v638_v36, %v133_v25  ;;  %v214_v46 = vadd.f32 %v639_v37, %v134_v26  ;;  %v215_v47 = vadd.f32 %v640_v38, %v135_v27 }
  0x39   :  { %v216_v48 = vadd.f32 %v641_v39, %v136_v29  ;;  %v217_v63 = vadd.f32 %v642_v40, %v137_v30  ;;  %v218_v1 = vadd.f32 %v643_v42, %v138_v31  ;;  %v219_v4 = vadd.f32 %v644_v43, %v139_v34 }
  0x3a   :  { %v275_v5 = vperm.slane %v212_v44, 0  ;;  %v277_v6 = vperm.slane %v213_v45, 0  ;;  %v279_v59 = vperm.slane %v214_v46, 0  ;;  %v281_v7 = vperm.slane %v215_v47, 0 }
  0x3b   :  { %v283_v57 = vperm.slane %v216_v48, 0  ;;  %v285_v60 = vperm.slane %v217_v63, 0  ;;  %v276_v32 = vperm.slane %v212_v44, 4  ;;  %v278_v49 = vperm.slane %v213_v45, 4 }
  0x3c   :  { %v291_v28 = vsel %vm244_vm0, %v277_v6, %v275_v5  ;;  %v280_v62 = vperm.slane %v214_v46, 4  ;;  %v287_v2 = vperm.slane %v218_v1, 0  ;;  %v282_v19 = vperm.slane %v215_v47, 4 }
  0x3d   :  { %v292_v3 = vsel %vm246_vm1, %v279_v59, %v291_v28  ;;  %v284_v20 = vperm.slane %v216_v48, 4  ;;  %v289_v21 = vperm.slane %v219_v4, 0  ;;  %v286_v58 = vperm.slane %v217_v63, 4 }
  0x3e   :  { %v293_v22 = vsel %vm248_vm2, %v281_v7, %v292_v3  ;;  %v298_v23 = vsel %vm244_vm0, %v278_v49, %v276_v32  ;;  %v288_v24 = vperm.slane %v218_v1, 4  ;;  %v290_v27 = vperm.slane %v219_v4, 4 }
  0x3f   :  { %v294_v61 = vsel %vm250_vm3, %v283_v57, %v293_v22  ;;  %v299_v25 = vsel %vm246_vm1, %v280_v62, %v298_v23  ;;  %v478_v38 = vsub.f32 %v863_v8, %v869_v15  ;;  %v479_v39 = vsub.f32 %v865_v9, %v871_v17 }
  0x40   :  { %v295_v26 = vsel %vm252_vm4, %v285_v60, %v294_v61  ;;  %v300_v29 = vsel %vm248_vm2, %v282_v19, %v299_v25  ;;  %v480_v40 = vsub.f32 %v867_v14, %v873_v18  ;;  %v76_v47 = vmax.f32 %v744_v50, %v797_v10 }
  0x41   :  { %v296_v30 = vsel %vm254_vm5, %v287_v2, %v295_v26  ;;  %v301_v31 = vsel %vm250_vm3, %v284_v20, %v300_v29  ;;  %v77_v48 = vmax.f32 %v749_v53, %v799_v11  ;;  %v78_v4 = vmax.f32 %v754_v54, %v801_v12 }
  0x42   :  { %v297_v33 = vsel %vm256_vm6, %v289_v21, %v296_v30  ;;  %v302_v34 = vsel %vm252_vm4, %v286_v58, %v301_v31  ;;  %v79_v5 = vmax.f32 %v759_v55, %v803_v13  ;;  %v80_v6 = vmax.f32 %v764_v56, %v805_v16 }
  0x43   :  { %436 = vmatmul.f32.gmra.mxu2 %v297_v33  ;;  %v303_v36 = vsel %vm254_vm5, %v288_v24, %v302_v34  ;;  %390 = vmatmul.f32.gmra.mxu0 %v297_v33  ;;  %v939_v57 = vmax.f32 %v76_v47, %v833_v35  ;;  %v942_v60 = vmax.f32 %v77_v48, %v841_v41  ;;  %v495_v28 = vadd.f32 0.003921569, %v865_v9 }
  0x44   :  { %v304_v37 = vsel %vm256_vm6, %v290_v27, %v303_v36  ;;  %v84_v49 = vmin.f32 %v744_v50, %v797_v10  ;;  %v948_v62 = vmax.f32 %v78_v4, %v853_v51  ;;  %v951_v2 = vmax.f32 %v79_v5, %v855_v52 }
  0x45   :  { %459 = vmatmul.f32.gmra.mxu3 %v304_v37  ;;  %413 = vmatmul.f32.gmra.mxu1 %v304_v37  ;;  %v954_v3 = vmax.f32 %v80_v6, %v859_v0  ;;  %v85_v19 = vmin.f32 %v749_v53, %v799_v11  ;;  %v496_v20 = vadd.f32 0.003921569, %v867_v14  ;;  %v86_v58 = vmin.f32 %v754_v54, %v801_v12 }
  0x46   :  { %v489_v50 = vadd.f32 0.003921569, %v939_v57  ;;  %v490_v10 = vadd.f32 0.003921569, %v942_v60  ;;  %v87_v61 = vmin.f32 %v759_v55, %v803_v13  ;;  %v88_v24 = vmin.f32 %v764_v56, %v805_v16 }
  0x47   :  { %v172_v53 = vmin.f32 %v84_v49, %v833_v35  ;;  %v491_v11 = vadd.f32 0.003921569, %v948_v62  ;;  %v492_v25 = vadd.f32 0.003921569, %v951_v2  ;;  %v493_v54 = vadd.f32 0.003921569, %v954_v3 }
  0x48   :  { %v173_v12 = vmin.f32 %v85_v19, %v841_v41  ;;  %v494_v26 = vadd.f32 0.003921569, %v863_v8  ;;  %v174_v55 = vmin.f32 %v86_v58, %v853_v51  ;;  %v175_v33 = vmin.f32 %v87_v61, %v855_v52 }
  0x49   :  { %v176_v34 = vmin.f32 %v88_v24, %v859_v0  ;;  %v473_v41 = vsub.f32 %v939_v57, %v172_v53  ;;  %v488_v8 = vadd.f32 0.003921569, %v480_v40 }
  0xae   :  { %v388_v42 = vpop.f32.mrf.mxu0 }
  0xb2   :  { %v411_v43 = vpop.f32.mrf.mxu1 }
  0xb3   :  { %v412_v44 = vadd.f32 %v411_v43, %v388_v42 }
  0xb4   :  { %v434_v45 = vpop.f32.mrf.mxu2 }
  0xb5   :  { %v645_v46 = vadd.f32 -0.5, %v412_v44  ;;  %v469_v4 = vmul.f32 %v412_v44, %v412_v44 }
  0xb7   :  { %v465_v59 = vand.u32 2147483647, %v645_v46  ;;  %v474_v46 = vsub.f32 %v942_v60, %v173_v12  ;;  %v477_v60 = vsub.f32 %v954_v3, %v176_v34 }
  0xb8   :  { %v457_v63 = vpop.f32.mrf.mxu3 }
  0xb9   :  { %v458_v1 = vadd.f32 %v457_v63, %v434_v45  ;;  %v467_v21 = vadd.f32 0.003921569, %v465_v59  ;;  %v475_v63 = vsub.f32 %v948_v62, %v174_v55  ;;  %v481_v62 = vadd.f32 0.003921569, %v473_v41 }
  0xba   :  { %v482_v44 = vadd.f32 0.003921569, %v474_v46 }
  0xbb   :  { %v646_v7 = vadd.f32 -0.5, %v458_v1  ;;  %v470_v5 = vmul.f32 %v458_v1, %v458_v1 }
  0xbd   :  { %v466_v32 = vand.u32 2147483647, %v646_v7 }
  0xbf   :  { %v468_v22 = vadd.f32 0.003921569, %v466_v32  ;;  %v476_v32 = vsub.f32 %v951_v2, %v175_v33 }
  0xc0   :  { %v391_v31 = vpop.f32.mrf.mxu0 }
  0xc1   :  { %v499_v23 = vrot.slane %v468_v22, 4 }
  0xc2   :  { %v414_v43 = vpop.f32.mrf.mxu1 }
  0xc3   :  { %v501_v27 = vsel %vm500_vm7, %v467_v21, %v499_v23  ;;  %v502_v29 = vsel %vm500_vm7, %v499_v23, %v467_v21  ;;  %v415_v59 = vadd.f32 %v414_v43, %v391_v31  ;;  %v483_v21 = vadd.f32 0.003921569, %v475_v63 }
  0xc4   :  { %v503_v13 = vrot.slane %v502_v29, 4  ;;  %v504_v56 = vrot.slane %v501_v27, 1  ;;  %v505_v16 = vrot.slane %v501_v27, 2  ;;  %v506_v35 = vrot.slane %v501_v27, 3 }
  0xc5   :  { %v518_v30 = vmul.f32 %v501_v27, %v489_v50  ;;  %v471_v1 = vsub.f32 %v415_v59, %v469_v4  ;;  %v484_v50 = vadd.f32 0.003921569, %v476_v32  ;;  %v487_v23 = vadd.f32 0.003921569, %v479_v39 }
  0xc6   :  { %v507_v36 = vrot.slane %v503_v13, 1  ;;  %v508_v37 = vrot.slane %v503_v13, 2  ;;  %v519_v42 = vmul.f32 %v504_v56, %v490_v10  ;;  %v437_v45 = vpop.f32.mrf.mxu2  ;;  %v509_v51 = vrot.slane %v503_v13, 3 }
  0xc7   :  { %v520_v47 = vmul.f32 %v505_v16, %v491_v11  ;;  %v521_v48 = vmul.f32 %v506_v35, %v492_v25  ;;  %v522_v6 = vmul.f32 %v503_v13, %v493_v54  ;;  %651 = vrcp.f32 %v518_v30 }
  0xc8   :  { %v460_v52 = vpop.f32.mrf.mxu3  ;;  %v523_v0 = vmul.f32 %v507_v36, %v494_v26  ;;  %653 = vrcp.f32 %v519_v42  ;;  %v524_v57 = vmul.f32 %v508_v37, %v495_v28  ;;  %v525_v49 = vmul.f32 %v509_v51, %v496_v20 }
  0xc9   :  { %v461_v7 = vadd.f32 %v460_v52, %v437_v45  ;;  %655 = vrcp.f32 %v520_v47  ;;  %v485_v10 = vadd.f32 0.003921569, %v477_v60  ;;  %v486_v28 = vadd.f32 0.003921569, %v478_v38 }
  0xca   :  { %657 = vrcp.f32 %v521_v48 }
  0xcb   :  { %v472_v19 = vsub.f32 %v461_v7, %v470_v5  ;;  %659 = vrcp.f32 %v522_v6 }
  0xcc   :  { %661 = vrcp.f32 %v523_v0 }
  0xcd   :  { %v536_v22 = vrot.slane %v472_v19, 4  ;;  %v652_v58 = vpop.eup %651  ;;  %663 = vrcp.f32 %v524_v57 }
  0xce   :  { %v654_v2 = vpop.eup %653  ;;  %665 = vrcp.f32 %v525_v49 }
  0xcf   :  { %v537_v3 = vsel %vm500_vm7, %v471_v1, %v536_v22  ;;  %v538_v20 = vsel %vm500_vm7, %v536_v22, %v471_v1  ;;  %v656_v61 = vpop.eup %655 }
  0xd0   :  { %v539_v24 = vrot.slane %v538_v20, 4  ;;  %v540_v53 = vrot.slane %v537_v3, 1  ;;  %v541_v11 = vrot.slane %v537_v3, 2  ;;  %v542_v25 = vrot.slane %v537_v3, 3  ;;  %v658_v54 = vpop.eup %657 }
  0xd1   :  { %v554_v12 = vmul.f32 %v537_v3, %v481_v62  ;;  %v660_v15 = vpop.eup %659 }
  0xd2   :  { %v543_v38 = vrot.slane %v539_v24, 1  ;;  %v544_v26 = vrot.slane %v539_v24, 2  ;;  %v545_v27 = vrot.slane %v539_v24, 3  ;;  %v555_v29 = vmul.f32 %v540_v53, %v482_v44  ;;  %v662_v55 = vpop.eup %661 }
  0xd3   :  { %v556_v13 = vmul.f32 %v541_v11, %v483_v21  ;;  %v557_v9 = vmul.f32 %v542_v25, %v484_v50  ;;  %v562_v17 = vmul.f32 %v652_v58, %v554_v12  ;;  %v664_v39 = vpop.eup %663  ;;  %v558_v56 = vmul.f32 %v539_v24, %v485_v10 }
  0xd4   :  { %v559_v16 = vmul.f32 %v543_v38, %v486_v28  ;;  %v563_v35 = vmul.f32 %v654_v2, %v555_v29  ;;  %v560_v30 = vmul.f32 %v544_v26, %v487_v23  ;;  %v666_v31 = vpop.eup %665  ;;  %v561_v14 = vmul.f32 %v545_v27, %v488_v8 }
  0xd5   :  { %v564_v33 = vmul.f32 %v656_v61, %v556_v13  ;;  %v565_v34 = vmul.f32 %v658_v54, %v557_v9  ;;  %v578_v41 = vperm.slane %v562_v17, 0  ;;  %v579_v18 = vperm.slane %v562_v17, 4 }
  0xd6   :  { %v580_v40 = vperm.slane %v563_v35, 0  ;;  %v581_v36 = vperm.slane %v563_v35, 4  ;;  %v567_v37 = vmul.f32 %v662_v55, %v559_v16  ;;  %v566_v42 = vmul.f32 %v660_v15, %v558_v56 }
  0xd7   :  { %v582_v43 = vperm.slane %v564_v33, 0  ;;  %v583_v45 = vperm.slane %v564_v33, 4  ;;  %v568_v47 = vmul.f32 %v664_v39, %v560_v30  ;;  %v569_v48 = vmul.f32 %v666_v31, %v561_v14 }
  0xd8   :  { %v594_v46 = vsel %vm244_vm0, %v580_v40, %v578_v41  ;;  %v601_v51 = vsel %vm244_vm0, %v581_v36, %v579_v18  ;;  %v584_v63 = vperm.slane %v565_v34, 0  ;;  %v585_v4 = vperm.slane %v565_v34, 4 }
  0xd9   :  { %v586_v5 = vperm.slane %v566_v42, 0  ;;  %v587_v6 = vperm.slane %v566_v42, 4  ;;  %v595_v52 = vsel %vm246_vm1, %v582_v43, %v594_v46  ;;  %v602_v0 = vsel %vm246_vm1, %v583_v45, %v601_v51 }
  0xda   :  { %v588_v59 = vperm.slane %v567_v37, 0  ;;  %v589_v7 = vperm.slane %v567_v37, 4  ;;  %v596_v57 = vsel %vm248_vm2, %v584_v63, %v595_v52  ;;  %v603_v32 = vsel %vm248_vm2, %v585_v4, %v602_v0 }
  0xdb   :  { %v590_v60 = vperm.slane %v568_v47, 0  ;;  %v591_v49 = vperm.slane %v568_v47, 4  ;;  %v597_v19 = vsel %vm250_vm3, %v586_v5, %v596_v57  ;;  %v604_v62 = vsel %vm250_vm3, %v587_v6, %v603_v32 }
  0xdc   :  { %v592_v44 = vperm.slane %v569_v48, 0  ;;  %v593_v1 = vperm.slane %v569_v48, 4  ;;  %v598_v21 = vsel %vm252_vm4, %v588_v59, %v597_v19  ;;  %v605_v22 = vsel %vm252_vm4, %v589_v7, %v604_v62 }
  0xdd   :  { %v599_v58 = vsel %vm254_vm5, %v590_v60, %v598_v21  ;;  %v606_v50 = vsel %vm254_vm5, %v591_v49, %v605_v22 }
  0xde   :  { %v600_v10 = vsel %vm256_vm6, %v592_v44, %v599_v58  ;;  %v607_v28 = vsel %vm256_vm6, %v593_v1, %v606_v50 }
  0xdf   :  { %610 = vst [vmem:[#allocation5] sm:$0xff] %v600_v10 }
  0xe0   :  { %611 = vst [vmem:[#allocation5 + $0x8] sm:$0xff] %v607_v28 }
  0xe1   :  { %622 = dma.vmem_to_hbm [thread:$0]  %s618_s3, 256, %s620_s6, [#allocation4]  }
  0xe2   :  { %717 = dma.done.wait [#allocation4], 256  }
  0xe3   :  { %718 = vsyncadd [#allocation4], 4294967040 }
  0xe4   :  { %627 = vsyncpa [#allocation3], 1 }
  0xe5   :  { %628 = vsyncpa [#allocation4], 1 }

</bundles_post_ra>
